<compile_context>
chip_gen: v5e
topology: v5e:2x2
jax: 0.10.0
libtpu: 0.0.40
codegen_flags: <defaults>
</compile_context>

<pallas_src>
import functools

import jax
import jax.numpy as jnp
from jax.experimental import pallas as pl
from jax.experimental.pallas import tpu as pltpu


def _round_up(a, b):
    return (a + b - 1) // b * b


def _tpu_vmem_and_kind():
    """Best-effort (VMEM capacity in bytes, device-kind string)."""
    kind = ""
    try:
        kind = jax.devices()[0].device_kind.lower()
    except Exception:
        pass
    vmem = None
    try:
        vmem = int(getattr(pltpu.get_tpu_info(), "vmem_capacity_bytes"))
    except Exception:
        vmem = None
    if not vmem or vmem <= 0:
        vmem = (64 << 20) if "v7" in kind else (128 << 20)
    return vmem, kind


# ---------------------------------------------------------------------------
# Fused single-pass kernel: pool -> reduce -> SiLU -> expand -> sigmoid -> scale
# ---------------------------------------------------------------------------
def _se_kernel(x_ref, w1t_ref, b1_ref, w2t_ref, b2_ref, o_ref, *, inv_hw):
    # x_ref:  (nb, C, HW)   w1t_ref: (C, S)   b1_ref: (1, S)
    # w2t_ref: (S, C)       b2_ref:  (1, C)   o_ref:  (nb, C, HW)
    x = x_ref[...]

    # Squeeze: global average pool over the spatial (lane) axis.
    # f32 accumulation without materializing an f32 copy of the whole tile.
    pooled = jnp.sum(x, axis=-1, dtype=jnp.float32) * inv_hw             # (nb, C)

    # Reduce 1x1 conv (MXU matmul) + SiLU.
    h = jnp.dot(pooled, w1t_ref[...], preferred_element_type=jnp.float32)
    h = h + b1_ref[...]
    h = h * jax.nn.sigmoid(h)                                            # (nb, S)

    # Expand 1x1 conv (MXU matmul) + sigmoid -> per-channel gate.
    g = jnp.dot(h, w2t_ref[...], preferred_element_type=jnp.float32)
    gate = jax.nn.sigmoid(g + b2_ref[...])                               # (nb, C)

    # Excite: only the tiny gate is cast; the activation tile keeps its
    # native (possibly packed) dtype — no full-tile up-cast.
    o_ref[...] = x * gate[:, :, None].astype(o_ref.dtype)


# ---------------------------------------------------------------------------
# Fallback excite-only kernel (used when a single image exceeds the VMEM block
# budget): simple per-channel scale, tiled over the spatial axis.
# ---------------------------------------------------------------------------
def _excite_kernel(x_ref, gate_ref, o_ref):
    # x_ref: (1, C, hw_t)   gate_ref: (1, C, 1)   o_ref: (1, C, hw_t)
    o_ref[...] = x_ref[...] * gate_ref[...].astype(o_ref.dtype)


def _se_two_pass_fallback(x2, w1t, b1, w2t, b2, *, vmem_cap):
    """Two-pass path for very large C*H*W (single image cannot double-buffer)."""
    # Pass 1 (plain JAX): pool + the two tiny 1x1 convs -> per-image gate.
    # TODO(synk): move the pooling pass into Pallas too (accumulator grid axis)
    # to overlap it with the gate matmuls; XLA's reduce is already HBM-optimal.
    N, C, HW = x2.shape
    itemsize = jnp.dtype(x2.dtype).itemsize

    pooled = jnp.mean(x2, axis=-1, dtype=jnp.float32)                    # (N, C)
    h = pooled @ w1t + b1
    h = h * jax.nn.sigmoid(h)
    gate = jax.nn.sigmoid(h @ w2t + b2)                                  # (N, C)
    gate3 = gate.reshape(N, C, 1)

    # Pass 2 (Pallas): excite multiply, tiled over the spatial axis.
    budget = int(vmem_cap * 0.75)
    c_pad = _round_up(C, max(8, 32 // itemsize))
    hw_t = max(128, ((budget // 4) // (c_pad * itemsize)) // 128 * 128)
    hw_t = int(min(hw_t, HW))
    grid = (N, pl.cdiv(HW, hw_t))
    vmem_limit = int(min(vmem_cap * 0.85,
                         max(32 << 20,
                             4 * c_pad * _round_up(hw_t, 128) * itemsize + (2 << 20))))
    return pl.pallas_call(
        _excite_kernel,
        out_shape=jax.ShapeDtypeStruct((N, C, HW), x2.dtype),
        grid_spec=pltpu.PrefetchScalarGridSpec(
            num_scalar_prefetch=0,
            grid=grid,
            in_specs=[
                pl.BlockSpec((1, C, hw_t), lambda n, h: (n, 0, h)),
                pl.BlockSpec((1, C, 1), lambda n, h: (n, 0, 0)),
            ],
            out_specs=pl.BlockSpec((1, C, hw_t), lambda n, h: (n, 0, h)),
        ),
        compiler_params=pltpu.CompilerParams(
            dimension_semantics=("parallel", "parallel"),
            vmem_limit_bytes=vmem_limit,
        ),
    )(x2, gate3)


def xpl_excite_and_squeeze(x, w_reduce, b_reduce, w_expand, b_expand,
                           *, target_block_bytes=None):
    """Fused Squeeze-and-Excite.

    x: (N, C, H, W).  1x1 conv weights stored as (out, in): w_reduce (S, C),
    b_reduce (S,), w_expand (C, S), b_expand (C,).  Returns (N, C, H, W).
    """
    N, C, H, W = x.shape
    S = w_reduce.shape[0]
    HW = H * W

    # Free (metadata-only) flattening of the spatial dims; no pad, no slice.
    x2 = x.reshape(N, C, HW)

    # Pre-transpose to f32 so both 1x1 convs are (nb, K) @ (K, M) MXU matmuls.
    w1t = jnp.asarray(w_reduce, jnp.float32).T           # (C, S)
    w2t = jnp.asarray(w_expand, jnp.float32).T           # (S, C)
    b1 = jnp.asarray(b_reduce, jnp.float32).reshape(1, S)
    b2 = jnp.asarray(b_expand, jnp.float32).reshape(1, C)

    vmem_cap, kind = _tpu_vmem_and_kind()
    itemsize = jnp.dtype(x.dtype).itemsize

    # In-VMEM footprint of one image's block, including sublane/lane padding.
    sub_mult = max(8, 32 // itemsize)                     # 8 (f32) / 16 (bf16) / 32 (i8)
    per_image_vmem = _round_up(C, sub_mult) * _round_up(HW, 128) * itemsize

    # >=25% VMEM headroom for weights/semaphores/compiler scratch; the pipeline
    # holds 2x-in + 2x-out buffers, so one block gets a quarter of the budget.
    budget = int(vmem_cap * 0.75)
    if target_block_bytes is None:
        # ~8-16 MiB blocks keep the ~0.35us per-step overhead below ~5%.
        target_block_bytes = min(16 << 20, max(2 << 20, budget // 4))
    block_budget = min(int(target_block_bytes), budget // 4)

    if 4 * per_image_vmem > budget:
        # A single image cannot be double-buffered in VMEM: two-pass fallback.
        out = _se_two_pass_fallback(x2, w1t, b1, w2t, b2, vmem_cap=vmem_cap)
        return out.reshape(N, C, H, W)

    nb = int(max(1, min(N, block_budget // per_image_vmem)))

    # v7x: shard the batch axis across both TensorCores (HBM BW is per-TC).
    is_v7 = "v7" in kind
    use_core_parallel = is_v7 and hasattr(pltpu, "CORE_PARALLEL") and N >= 2
    if use_core_parallel:
        nb = int(min(nb, max(1, pl.cdiv(N, 2))))          # at least 2 blocks
    grid_n = pl.cdiv(N, nb)
    use_core_parallel = use_core_parallel and grid_n >= 2

    weight_bytes = 4 * (C * S + S + S * C + C)
    vmem_limit = int(min(vmem_cap * 0.85,
                         max(32 << 20,
                             4 * nb * per_image_vmem + weight_bytes + (2 << 20))))

    # Advisory cost: ~2 full-tensor HBM passes + a handful of flops.
    cost = pl.CostEstimate(
        flops=int(2 * N * C * HW + 4 * N * C * S),
        transcendentals=int(2 * N * (C + S)),
        bytes_accessed=int(2 * N * C * HW * itemsize + weight_bytes),
    )

    kernel = functools.partial(_se_kernel, inv_hw=1.0 / HW)

    def run(dim_semantics):
        return pl.pallas_call(
            kernel,
            out_shape=jax.ShapeDtypeStruct((N, C, HW), x.dtype),
            grid_spec=pltpu.PrefetchScalarGridSpec(
                num_scalar_prefetch=0,
                grid=(grid_n,),
                in_specs=[
                    # NOTE: if a v7x xprof trace shows the next input DMA exposed
                    # behind the pool->matmul->gate chain, add
                    # pipeline_mode=pl.Buffered(3) here (budget one extra block).
                    pl.BlockSpec((nb, C, HW), lambda n: (n, 0, 0)),
                    pl.BlockSpec((C, S), lambda n: (0, 0)),
                    pl.BlockSpec((1, S), lambda n: (0, 0)),
                    pl.BlockSpec((S, C), lambda n: (0, 0)),
                    pl.BlockSpec((1, C), lambda n: (0, 0)),
                ],
                out_specs=pl.BlockSpec((nb, C, HW), lambda n: (n, 0, 0)),
            ),
            compiler_params=pltpu.CompilerParams(
                dimension_semantics=dim_semantics,
                vmem_limit_bytes=vmem_limit,
            ),
            cost_estimate=cost,
        )(x2, w1t, b1, w2t, b2)

    if use_core_parallel:
        try:
            out = jax.block_until_ready(run((pltpu.CORE_PARALLEL,)))
        except Exception:
            out = run(("parallel",))          # safe fallback
    else:
        out = run(("parallel",))

    # Ragged final batch block (N % nb != 0): its out-of-range rows only read
    # unspecified data; rows are fully independent through pool->matmul->gate,
    # so nothing leaks into valid rows and the out-of-range writes are dropped.
    return out.reshape(N, C, H, W)


def _reference(x, w_reduce, b_reduce, w_expand, b_expand):
    # Pure-JAX reference matching the PyTorch module semantics.
    pooled = jnp.mean(x, axis=(2, 3))                        # (N, C)
    h = pooled @ w_reduce.T + b_reduce                       # (N, S)
    h = h * jax.nn.sigmoid(h)                                # SiLU
    g = jax.nn.sigmoid(h @ w_expand.T + b_expand)            # (N, C)
    return x * g[:, :, None, None]


if __name__ == "__main__":
    # Small shapes consistent with the module's forward.
    N, C, S, H, W = 2, 4, 2, 16, 16

    key = jax.random.PRNGKey(0)
    kx, kw1, kb1, kw2, kb2 = jax.random.split(key, 5)

    x = jax.random.normal(kx, (N, C, H, W), dtype=jnp.float32)

    # Conv2d 1x1 weights are (out, in, 1, 1) -> stored here as (out, in),
    # scaled like the PyTorch default fan-in bound.
    w_reduce = jax.random.uniform(kw1, (S, C), jnp.float32,
                                  minval=-1.0, maxval=1.0) / jnp.sqrt(C)
    b_reduce = jax.random.uniform(kb1, (S,), jnp.float32,
                                  minval=-1.0, maxval=1.0) / jnp.sqrt(C)
    w_expand = jax.random.uniform(kw2, (C, S), jnp.float32,
                                  minval=-1.0, maxval=1.0) / jnp.sqrt(S)
    b_expand = jax.random.uniform(kb2, (C,), jnp.float32,
                                  minval=-1.0, maxval=1.0) / jnp.sqrt(S)

    out = xpl_excite_and_squeeze(x, w_reduce, b_reduce, w_expand, b_expand)
    out = jax.block_until_ready(out)

    ref = _reference(x, w_reduce, b_reduce, w_expand, b_expand)
    assert out.shape == ref.shape == (N, C, H, W)
    assert jnp.allclose(out, ref, atol=1e-5, rtol=1e-5), "mismatch vs reference"

    print("KERNEL_OK")
</pallas_src>

<mosaic_0001>
module attributes {stable_mosaic.version = 11 : i64} {
  func.func @_se_kernel(%arg0: i32, %arg1: memref<2x4x256xf32, #tpu.memory_space<vmem>>, %arg2: memref<4x2xf32, #tpu.memory_space<vmem>>, %arg3: memref<1x2xf32, #tpu.memory_space<vmem>>, %arg4: memref<2x4xf32, #tpu.memory_space<vmem>>, %arg5: memref<1x4xf32, #tpu.memory_space<vmem>>, %arg6: memref<2x4x256xf32, #tpu.memory_space<vmem>>) attributes {dimension_semantics = [#tpu.dimension_semantics<parallel>], iteration_bounds = array<i64: 1>, scalar_prefetch = 0 : i64, scratch_operands = 0 : i64, tpu.core_type = #tpu.core_type<tc>, window_params = [{transform_indices = @transform_0, window_bounds = array<i64: 2, 4, 256>}, {pipeline_mode = #tpu.pipeline_mode<synchronous>, transform_indices = @transform_1, window_bounds = array<i64: 4, 2>}, {pipeline_mode = #tpu.pipeline_mode<synchronous>, transform_indices = @transform_2, window_bounds = array<i64: 1, 2>}, {pipeline_mode = #tpu.pipeline_mode<synchronous>, transform_indices = @transform_3, window_bounds = array<i64: 2, 4>}, {pipeline_mode = #tpu.pipeline_mode<synchronous>, transform_indices = @transform_4, window_bounds = array<i64: 1, 4>}, {transform_indices = @transform_5, window_bounds = array<i64: 2, 4, 256>}]} {
    %c0 = arith.constant 0 : index
    %c0_0 = arith.constant 0 : index
    %c0_1 = arith.constant 0 : index
    %0 = vector.load %arg1[%c0, %c0_0, %c0_1] : memref<2x4x256xf32, #tpu.memory_space<vmem>>, vector<2x4x256xf32>
    %cst = arith.constant dense<0.000000e+00> : vector<2x4xf32>
    %1 = vector.multi_reduction <add>, %0, %cst [2] : vector<2x4x256xf32> to vector<2x4xf32>
    %cst_2 = arith.constant 3.906250e-03 : f32
    %2 = vector.broadcast %cst_2 : f32 to vector<2x4xf32>
    %3 = arith.mulf %1, %2 : vector<2x4xf32>
    %c0_3 = arith.constant 0 : index
    %c0_4 = arith.constant 0 : index
    %4 = vector.load %arg2[%c0_3, %c0_4] : memref<4x2xf32, #tpu.memory_space<vmem>>, vector<4x2xf32>
    %cst_5 = arith.constant dense<0.000000e+00> : vector<2x2xf32>
    %5 = tpu.matmul %3, %4, %cst_5 {dimension_numbers = #tpu.dot_dimension_numbers<[1], [0], [0], [1], [0, 0, 1, 1], [], []>} : vector<2x4xf32>, vector<4x2xf32>, vector<2x2xf32> -> vector<2x2xf32>
    %c0_6 = arith.constant 0 : index
    %c0_7 = arith.constant 0 : index
    %6 = vector.load %arg3[%c0_6, %c0_7] : memref<1x2xf32, #tpu.memory_space<vmem>>, vector<1x2xf32>
    %7 = vector.broadcast %6 : vector<1x2xf32> to vector<2x2xf32>
    %8 = arith.addf %5, %7 : vector<2x2xf32>
    %9 = arith.negf %8 : vector<2x2xf32>
    %10 = math.exp %9 : vector<2x2xf32>
    %cst_8 = arith.constant 1.000000e+00 : f32
    %11 = vector.broadcast %cst_8 : f32 to vector<2x2xf32>
    %12 = arith.addf %11, %10 : vector<2x2xf32>
    %13 = arith.divf %11, %12 : vector<2x2xf32>
    %14 = arith.mulf %8, %13 : vector<2x2xf32>
    %c0_9 = arith.constant 0 : index
    %c0_10 = arith.constant 0 : index
    %15 = vector.load %arg4[%c0_9, %c0_10] : memref<2x4xf32, #tpu.memory_space<vmem>>, vector<2x4xf32>
    %cst_11 = arith.constant dense<0.000000e+00> : vector<2x4xf32>
    %16 = tpu.matmul %14, %15, %cst_11 {dimension_numbers = #tpu.dot_dimension_numbers<[1], [0], [0], [1], [0, 0, 1, 1], [], []>} : vector<2x2xf32>, vector<2x4xf32>, vector<2x4xf32> -> vector<2x4xf32>
    %c0_12 = arith.constant 0 : index
    %c0_13 = arith.constant 0 : index
    %17 = vector.load %arg5[%c0_12, %c0_13] : memref<1x4xf32, #tpu.memory_space<vmem>>, vector<1x4xf32>
    %18 = vector.broadcast %17 : vector<1x4xf32> to vector<2x4xf32>
    %19 = arith.addf %16, %18 : vector<2x4xf32>
    %20 = arith.negf %19 : vector<2x4xf32>
    %21 = math.exp %20 : vector<2x4xf32>
    %cst_14 = arith.constant 1.000000e+00 : f32
    %22 = vector.broadcast %cst_14 : f32 to vector<2x4xf32>
    %23 = arith.addf %22, %21 : vector<2x4xf32>
    %24 = arith.divf %22, %23 : vector<2x4xf32>
    %25 = vector.shape_cast %24 : vector<2x4xf32> to vector<2x4x1xf32>
    %26 = vector.broadcast %25 : vector<2x4x1xf32> to vector<2x4x256xf32>
    %27 = arith.mulf %0, %26 : vector<2x4x256xf32>
    %c0_15 = arith.constant 0 : index
    %c0_16 = arith.constant 0 : index
    %c0_17 = arith.constant 0 : index
    %28 = vector.load %arg6[%c0_15, %c0_16, %c0_17] : memref<2x4x256xf32, #tpu.memory_space<vmem>>, vector<2x4x256xf32>
    tpu.vector_store %arg6[%c0_15, %c0_16, %c0_17], %27 {strides = array<i32>} : memref<2x4x256xf32, #tpu.memory_space<vmem>>, vector<2x4x256xf32>,
    return
  }
  func.func @transform_0(%arg0: i32) -> (i32, i32, i32) {
    %c0_i32 = arith.constant 0 : i32
    %c0_i32_0 = arith.constant 0 : i32
    %c0_i32_1 = arith.constant 0 : i32
    return %arg0, %c0_i32, %c0_i32_0 : i32, i32, i32
  }
  func.func @transform_1(%arg0: i32) -> (i32, i32) {
    %c0_i32 = arith.constant 0 : i32
    %c0_i32_0 = arith.constant 0 : i32
    %c0_i32_1 = arith.constant 0 : i32
    return %c0_i32, %c0_i32_0 : i32, i32
  }
  func.func @transform_2(%arg0: i32) -> (i32, i32) {
    %c0_i32 = arith.constant 0 : i32
    %c0_i32_0 = arith.constant 0 : i32
    %c0_i32_1 = arith.constant 0 : i32
    return %c0_i32, %c0_i32_0 : i32, i32
  }
  func.func @transform_3(%arg0: i32) -> (i32, i32) {
    %c0_i32 = arith.constant 0 : i32
    %c0_i32_0 = arith.constant 0 : i32
    %c0_i32_1 = arith.constant 0 : i32
    return %c0_i32, %c0_i32_0 : i32, i32
  }
  func.func @transform_4(%arg0: i32) -> (i32, i32) {
    %c0_i32 = arith.constant 0 : i32
    %c0_i32_0 = arith.constant 0 : i32
    %c0_i32_1 = arith.constant 0 : i32
    return %c0_i32, %c0_i32_0 : i32, i32
  }
  func.func @transform_5(%arg0: i32) -> (i32, i32, i32) {
    %c0_i32 = arith.constant 0 : i32
    %c0_i32_0 = arith.constant 0 : i32
    %c0_i32_1 = arith.constant 0 : i32
    return %arg0, %c0_i32, %c0_i32_0 : i32, i32, i32
  }
}

</mosaic_0001>

<bundles_post_ra>
// kernel: tpu_custom_call.1
= control target key start
LH: loop header
LB: loop body
LE: loop exit
PB: predicated region body
PF: predicated region fallthrough
CT: control target
= control target key end

     0   :  { %10 = vsyncpa [#allocation3], 0  ;;  %s367_s0 = inlined_call_operand.hbm [shape: f32[2,4,256], index: 0, kind: input, shape index: {}]   ;;  %s368_s1 = inlined_call_operand.vmem [shape: f32[4,2], index: 1, kind: input, shape index: {}]   ;;  %s369_s2 = inlined_call_operand.vmem [shape: f32[1,2], index: 2, kind: input, shape index: {}]   ;;  %s370_s3 = inlined_call_operand.vmem [shape: f32[2,4], index: 3, kind: input, shape index: {}]   ;;  %s371_s4 = inlined_call_operand.vmem [shape: f32[1,4], index: 4, kind: input, shape index: {}]   ;;  %s372_s5 = inlined_call_operand.hbm [shape: f32[2,4,256], index: 5, kind: output, shape index: {}]  }
   0x1   :  { %11 = vsyncpa [#allocation4], 0  ;;  %s16_s20 = sshll.u32 %s367_s0, 4  ;;  %s300_s21 = smov [#allocation2]   ;;  %s17_s20 = int_to_ptr.hbm [resolvable:$true] %s16_s20 }
   0x2   :  { %s18_s22 = sshll.u32 %s300_s21, 4  ;;  %s301_s23 = smov 128   ;;  %s19_s22 = int_to_ptr.vmem [resolvable:$true] %s18_s22 }
   0x3   :  { %s302_s24 = smov 8  }
   0x4   :  { %24 = dma.hbm_to_vmem [thread:$0]  %s17_s20, 256, %s19_s22, [#allocation3], %s301_s23, %s301_s23, %s302_s24  }
   0x5   :  { %296 = dma.done.wait [#allocation3], 256  }
   0x6   :  { %297 = vsyncadd [#allocation3], 4294967040  ;;  %v341_v0 = vld [vmem:[#allocation2] sm:$0xff]  ;;  %v343_v1 = vld [vmem:[#allocation2 + $0x8] sm:$0xff]  ;;  %vm52_vm0 = vcmask 1043456   ;;  %v72_v14 = vlaneseq  ;;  %vm76_vm1 = vcmask 1041409  }
   0x7   :  { %41 = vst [vmem:[#allocation1] ss:$2 sm:$0xff] %v341_v0  ;;  %v65_v12 = vld [vmem:[%s368_s1] sm:$0xf]  ;;  %vm78_vm2 = vcmask 31744   ;;  %vm133_vm3 = vcmask 1041408  }
   0x8   :  { %45 = vst [vmem:[#allocation1 + $0x10] ss:$2 sm:$0xff] %v343_v1  ;;  %225 = vmatpush.msk.msra.mxu0 %vm52_vm0, %v65_v12  ;;  %v73_v15 = vand.u32 127, %v72_v14  ;;  %v238_v22 = vld [vmem:[%s369_s2] ss:$0 sm:$0xff]  ;;  %vm129_vm8 = vcmask 15360  }
   0x9   :  { %v124_v23 = vld [vmem:[%s370_s3] sm:$0x3]  ;;  %v178_v40 = vshrl.u32 %v72_v14, 7  ;;  %v303_v59 = vmov 839922192   ;;  %s304_s3 = smov [#allocation5]  }
   0xa   :  { %228 = vmatpush.msk.msra.mxu1 %vm133_vm3, %v124_v23  ;;  %v239_v41 = vld [vmem:[%s371_s4] ss:$0 sm:$0xff]  ;;  %v193_v60 = vunpack.c.l.s4 %v303_v59  ;;  %s210_s4 = sshll.u32 %s304_s3, 4  ;;  %s212_s7 = sshll.u32 %s372_s5, 4  ;;  %s211_s4 = int_to_ptr.vmem [resolvable:$true] %s210_s4  ;;  %s213_s7 = int_to_ptr.hbm [resolvable:$true] %s212_s7 }
   0xb   :  { %236 = vset.pattern.permute.xlu1 %v178_v40  ;;  %237 = vset.pattern.permute.xlu0 %v178_v40 }
   0xc   :  { %v194_v61 = vunpack.c.0.s8 %v193_v60 }
   0xe   :  { %v42_v2 = vld.sshfl [vmem:[#allocation1] sm:$0xff pattern:$0x75316420]  ;;  %v43_v3 = vld.sshfl [vmem:[#allocation1 + $0x8] sm:$0xff pattern:$0x75316420] }
   0xf   :  { %v53_v4 = vsel %vm52_vm0, %v42_v2, 0.0  ;;  %v54_v5 = vsel %vm52_vm0, %v43_v3, 0.0  ;;  %v46_v7 = vld.sshfl [vmem:[#allocation1 + $0x10] sm:$0xff pattern:$0x75316420] }
  0x10   :  { %v55_v6 = vadd.f32 %v54_v5, %v53_v4  ;;  %v47_v8 = vld.sshfl [vmem:[#allocation1 + $0x18] sm:$0xff pattern:$0x75316420]  ;;  %v58_v9 = vsel %vm52_vm0, %v46_v7, 0.0 }
  0x11   :  { %v59_v10 = vsel %vm52_vm0, %v47_v8, 0.0 }
  0x12   :  { %56 = vadd.xlane.f32.xlu0 %v55_v6  ;;  %v60_v11 = vadd.f32 %v59_v10, %v58_v9 }
  0x1a   :  { %61 = vadd.xlane.f32.xlu0 %v60_v11 }
  0x85   :  { %v57_v13 = vpop.xlane.xlu0 %56 }
  0x86   :  { %v63_v16 = vmul.f32 0.00390625, %v57_v13 }
  0x88   :  { %v74_v19 = vperm.slane %v63_v16, %v73_v15 }
  0x8d   :  { %v62_v17 = vpop.xlane.xlu0 %61 }
  0x8e   :  { %v64_v18 = vmul.f32 0.00390625, %v62_v17 }
  0x90   :  { %v75_v20 = vperm.slane %v64_v18, %v73_v15 }
  0x92   :  { %v77_v21 = vsel %vm76_vm1, %v75_v20, %v74_v19 }
  0x93   :  { %226 = vmatmul.msk.f32.vlgmr.msra.gmra.mxu0 %vm78_vm2, %v77_v21 }
 0x110   :  { %v101_v24 = vpop.f32.mrf.mxu0 }
 0x111   :  { %v102_v25 = vadd.f32 %v238_v22, %v101_v24 }
 0x113   :  { %v227_v26 = vmul.f32 -1.442695, %v102_v25 }
 0x115   :  { %240 = vpow2.f32 %v227_v26 }
 0x11b   :  { %v241_v27 = vpop.eup %240 }
 0x11c   :  { %v107_v28 = vadd.f32 1.0, %v241_v27 }
 0x11e   :  { %242 = vrcp.f32 %v107_v28  ;;  %v119_v32 = vand.u32 2147483648, %v107_v28  ;;  %v117_v34 = vand.u32 2147483647, %v107_v28  ;;  %vm113_vm5 = vweird.f32 %v107_v28 }
 0x120   :  { %v120_v36 = vor.u32 1.1754944e-38, %v119_v32  ;;  %vm118_vm7 = vcmp.eq.f32.partialorder %v117_v34, 8.507059e+37 }
 0x124   :  { %v243_v29 = vpop.eup %242 }
 0x125   :  { %v109_v30 = vmul.f32 %v243_v29, %v107_v28  ;;  %vm114_vm4 = vweird.f32 %v243_v29 }
 0x126   :  { %vm115_vm6 = vmor %vm113_vm5, %vm114_vm4 }
 0x127   :  { %v110_v31 = vsub.f32 1.0, %v109_v30 }
 0x129   :  { %v111_v33 = vmul.f32 %v243_v29, %v110_v31 }
 0x12b   :  { %v112_v35 = vadd.f32 %v243_v29, %v111_v33 }
 0x12d   :  { %v116_v37 = vsel %vm115_vm6, %v243_v29, %v112_v35 }
 0x12e   :  { %v121_v38 = vsel %vm118_vm7, %v120_v36, %v116_v37 }
 0x12f   :  { %v123_v39 = vmul.f32 %v121_v38, %v102_v25 }
 0x131   :  { %229 = vmatmul.msk.f32.vlgmr.msra.gmra.mxu1 %vm129_vm8, %v123_v39 }
 0x1ae   :  { %v154_v42 = vpop.f32.mrf.mxu1 }
 0x1af   :  { %v155_v43 = vadd.f32 %v239_v41, %v154_v42 }
 0x1b1   :  { %v230_v44 = vmul.f32 -1.442695, %v155_v43 }
 0x1b3   :  { %244 = vpow2.f32 %v230_v44 }
 0x1b9   :  { %v245_v45 = vpop.eup %244 }
 0x1ba   :  { %v160_v46 = vadd.f32 1.0, %v245_v45 }
 0x1bc   :  { %246 = vrcp.f32 %v160_v46  ;;  %v172_v50 = vand.u32 2147483648, %v160_v46  ;;  %v170_v52 = vand.u32 2147483647, %v160_v46  ;;  %vm166_vm10 = vweird.f32 %v160_v46 }
 0x1be   :  { %v173_v54 = vor.u32 1.1754944e-38, %v172_v50  ;;  %vm171_vm12 = vcmp.eq.f32.partialorder %v170_v52, 8.507059e+37 }
 0x1c2   :  { %v247_v47 = vpop.eup %246 }
 0x1c3   :  { %v162_v48 = vmul.f32 %v247_v47, %v160_v46  ;;  %vm167_vm9 = vweird.f32 %v247_v47 }
 0x1c4   :  { %vm168_vm11 = vmor %vm166_vm10, %vm167_vm9 }
 0x1c5   :  { %v163_v49 = vsub.f32 1.0, %v162_v48 }
 0x1c7   :  { %v164_v51 = vmul.f32 %v247_v47, %v163_v49 }
 0x1c9   :  { %v165_v53 = vadd.f32 %v247_v47, %v164_v51 }
 0x1cb   :  { %v169_v55 = vsel %vm168_vm11, %v247_v47, %v165_v53 }
 0x1cc   :  { %v174_v56 = vsel %vm171_vm12, %v173_v54, %v169_v55 }
 0x1cd   :  { %v176_v57 = vperm.slane %v174_v56, 0  ;;  %v183_v58 = vperm.slane %v174_v56, 1 }
 0x1cf   :  { %181 = vperm.xlu1 %236, %v176_v57  }
 0x1d7   :  { %188 = vperm.xlu1 %236, %v183_v58  }
 0x241   :  { %v182_v62 = vpop.permute.xlu1 %181 }
 0x242   :  { %v195_v63 = vperm.slane %v182_v62, %v194_v61 }
 0x244   :  { %v202_v2 = vmul.f32 %v195_v63, %v341_v0 }
 0x246   :  { %204 = vst [vmem:[#allocation5] sm:$0xff] %v202_v2 }
 0x249   :  { %v189_v3 = vpop.permute.xlu1 %188 }
 0x24a   :  { %v199_v4 = vperm.slane %v189_v3, %v194_v61 }
 0x24c   :  { %v203_v5 = vmul.f32 %v199_v4, %v343_v1 }
 0x24e   :  { %205 = vst [vmem:[#allocation5 + $0x8] sm:$0xff] %v203_v5 }
 0x24f   :  { %218 = dma.vmem_to_hbm [thread:$0]  %s211_s4, 256, %s213_s7, [#allocation4], %s301_s23, %s301_s23, %s302_s24  }
 0x250   :  { %298 = dma.done.wait [#allocation4], 256  }
 0x251   :  { %299 = vsyncadd [#allocation4], 4294967040 }
 0x252   :  { %223 = vsyncpa [#allocation3], 1 }
 0x253   :  { %224 = vsyncpa [#allocation4], 1 }

</bundles_post_ra>
